<compile_context>
chip_gen: v7x
topology: tpu7x:2x2x1
jax: 0.10.0
libtpu: 0.0.40
codegen_flags: <defaults>
</compile_context>

<pallas_src>
import jax
import jax.numpy as jnp
from jax.experimental import pallas as pl
from jax.experimental.pallas import tpu as pltpu


def _downsample_kernel(x_ref, w_ref, b_ref, o_ref):
    # x_ref: (C_in, TM)   w_ref: (C_out, C_in)   b_ref: (C_out, 1)
    # o_ref: (C_out, TM)
    y = jnp.dot(w_ref[...], x_ref[...], preferred_element_type=jnp.float32)
    o_ref[...] = (y + b_ref[...]).astype(o_ref.dtype)


def _pick_m_tile(m: int) -> int:
    if m < 128:
        return m                          # full dim -> always a legal block
    return min(1024, (m // 128) * 128)    # lane-dense multiple of 128


def downsample(x, weight, bias, stride: int):
    """x: (B, C_in, F, T); weight: (C_out, C_in, 1, 1); bias: (C_out,).
    Returns (B, C_out, F_out, T), F_out = floor((F - 1) / stride) + 1."""
    B, C_in, F, T = x.shape
    C_out = weight.shape[0]
    F_out = (F - 1) // stride + 1

    # Strided-row selection (only when needed); everything after is reshape-only.
    x_sub = x if stride == 1 else x[:, :, ::stride, :]
    M = F_out * T
    x2 = x_sub.reshape(B, C_in, M)        # free reshape (adjacent dims merge)
    w2 = weight.reshape(C_out, C_in)
    b2 = bias.reshape(C_out, 1)

    TM = _pick_m_tile(M)
    grid = (B, pl.cdiv(M, TM))

    itemsize = jnp.dtype(x.dtype).itemsize
    cost = pl.CostEstimate(
        flops=2 * B * M * C_in * C_out,
        transcendentals=0,
        bytes_accessed=(B * C_in * M + B * C_out * M) * itemsize
        + (C_out * C_in + C_out) * jnp.dtype(weight.dtype).itemsize,
    )

    y2 = pl.pallas_call(
        _downsample_kernel,
        out_shape=jax.ShapeDtypeStruct((B, C_out, M), x.dtype),
        grid=grid,
        in_specs=[
            # x: one batch element, TM columns of the collapsed (F_out*T) axis.
            pl.BlockSpec((None, C_in, TM), lambda b, m: (b, 0, m)),
            # weight / bias: constant index_map -> resident across the grid.
            pl.BlockSpec((C_out, C_in), lambda b, m: (0, 0)),
            pl.BlockSpec((C_out, 1), lambda b, m: (0, 0)),
        ],
        out_specs=pl.BlockSpec((None, C_out, TM), lambda b, m: (b, 0, m)),
        compiler_params=pltpu.CompilerParams(
            dimension_semantics=("parallel", "parallel"),
        ),
        cost_estimate=cost,
    )(x2, w2, b2)

    return y2.reshape(B, C_out, F_out, T)


if __name__ == "__main__":
    B, C_in, C_out, F, T = 2, 4, 8, 16, 16
    stride = 2

    key = jax.random.PRNGKey(0)
    kx, kw, kb = jax.random.split(key, 3)

    x = jax.random.normal(kx, (B, C_in, F, T), dtype=jnp.float32)
    # Synthetic Conv2d(C_in, C_out, 1, (stride, 1)) parameters.
    weight = jax.random.normal(kw, (C_out, C_in, 1, 1), dtype=jnp.float32) * 0.1
    bias = jax.random.normal(kb, (C_out,), dtype=jnp.float32) * 0.1

    fn = jax.jit(downsample, static_argnames=("stride",))
    y = jax.block_until_ready(fn(x, weight, bias, stride=stride))

    # Pure-JAX reference (1x1 conv with stride (stride, 1)).
    x_ref = x[:, :, ::stride, :]
    ref = (
        jnp.einsum("bcft,oc->boft", x_ref, weight.reshape(C_out, C_in))
        + bias[None, :, None, None]
    )

    assert y.shape == (B, C_out, (F - 1) // stride + 1, T), y.shape
    assert jnp.allclose(y, ref, atol=1e-5, rtol=1e-5)
    print("KERNEL_OK")
</pallas_src>

<mosaic_0001>
module attributes {stable_mosaic.version = 11 : i64} {
  func.func @_downsample_kernel(%arg0: i32, %arg1: i32, %arg2: memref<1x4x128xf32, #tpu.memory_space<vmem>>, %arg3: memref<8x4xf32, #tpu.memory_space<vmem>>, %arg4: memref<8x1xf32, #tpu.memory_space<vmem>>, %arg5: memref<1x8x128xf32, #tpu.memory_space<vmem>>) attributes {dimension_semantics = [#tpu.dimension_semantics<parallel>, #tpu.dimension_semantics<parallel>], iteration_bounds = array<i64: 2, 1>, scalar_prefetch = 0 : i64, scratch_operands = 0 : i64, tpu.core_type = #tpu.core_type<tc>, window_params = [{transform_indices = @transform_0, window_bounds = array<i64: 1, 4, 128>}, {pipeline_mode = #tpu.pipeline_mode<synchronous>, transform_indices = @transform_1, window_bounds = array<i64: 8, 4>}, {pipeline_mode = #tpu.pipeline_mode<synchronous>, transform_indices = @transform_2, window_bounds = array<i64: 8, 1>}, {transform_indices = @transform_3, window_bounds = array<i64: 1, 8, 128>}]} {
    %c0 = arith.constant 0 : index
    %c0_0 = arith.constant 0 : index
    %0 = vector.load %arg3[%c0, %c0_0] : memref<8x4xf32, #tpu.memory_space<vmem>>, vector<8x4xf32>
    %c0_1 = arith.constant 0 : index
    %c0_2 = arith.constant 0 : index
    %c0_3 = arith.constant 0 : index
    %1 = vector.load %arg2[%c0_1, %c0_2, %c0_3] : memref<1x4x128xf32, #tpu.memory_space<vmem>>, vector<1x4x128xf32>
    %2 = vector.shape_cast %1 : vector<1x4x128xf32> to vector<4x128xf32>
    %cst = arith.constant dense<0.000000e+00> : vector<8x128xf32>
    %3 = tpu.matmul %0, %2, %cst {dimension_numbers = #tpu.dot_dimension_numbers<[1], [0], [0], [1], [0, 0, 1, 1], [], []>} : vector<8x4xf32>, vector<4x128xf32>, vector<8x128xf32> -> vector<8x128xf32>
    %c0_4 = arith.constant 0 : index
    %c0_5 = arith.constant 0 : index
    %4 = vector.load %arg4[%c0_4, %c0_5] : memref<8x1xf32, #tpu.memory_space<vmem>>, vector<8x1xf32>
    %5 = vector.broadcast %4 : vector<8x1xf32> to vector<8x128xf32>
    %6 = arith.addf %3, %5 : vector<8x128xf32>
    %c0_6 = arith.constant 0 : index
    %c0_7 = arith.constant 0 : index
    %c0_8 = arith.constant 0 : index
    %7 = vector.load %arg5[%c0_6, %c0_7, %c0_8] : memref<1x8x128xf32, #tpu.memory_space<vmem>>, vector<1x8x128xf32>
    %8 = vector.shape_cast %7 : vector<1x8x128xf32> to vector<8x128xf32>
    %9 = vector.shape_cast %6 : vector<8x128xf32> to vector<1x8x128xf32>
    tpu.vector_store %arg5[%c0_6, %c0_7, %c0_8], %9 {strides = array<i32>} : memref<1x8x128xf32, #tpu.memory_space<vmem>>, vector<1x8x128xf32>,
    return
  }
  func.func @transform_0(%arg0: i32, %arg1: i32) -> (i32, i32, i32) {
    %c0_i32 = arith.constant 0 : i32
    %c0_i32_0 = arith.constant 0 : i32
    return %arg0, %c0_i32, %arg1 : i32, i32, i32
  }
  func.func @transform_1(%arg0: i32, %arg1: i32) -> (i32, i32) {
    %c0_i32 = arith.constant 0 : i32
    %c0_i32_0 = arith.constant 0 : i32
    %c0_i32_1 = arith.constant 0 : i32
    return %c0_i32, %c0_i32_0 : i32, i32
  }
  func.func @transform_2(%arg0: i32, %arg1: i32) -> (i32, i32) {
    %c0_i32 = arith.constant 0 : i32
    %c0_i32_0 = arith.constant 0 : i32
    %c0_i32_1 = arith.constant 0 : i32
    return %c0_i32, %c0_i32_0 : i32, i32
  }
  func.func @transform_3(%arg0: i32, %arg1: i32) -> (i32, i32, i32) {
    %c0_i32 = arith.constant 0 : i32
    %c0_i32_0 = arith.constant 0 : i32
    return %arg0, %c0_i32, %arg1 : i32, i32, i32
  }
}

</mosaic_0001>

<bundles_post_ra>
// kernel: downsample.1
= control target key start
LH: loop header
LB: loop body
LE: loop exit
PB: predicated region body
PF: predicated region fallthrough
CT: control target
= control target key end

     0   :  { %s451_s12 = smov 0   ;;  %s453_s13 = smov 0   ;;  %s490_s0 = inlined_call_operand.vmem [shape: f32[2,4,128], index: 0, kind: input, shape index: {}]   ;;  %s491_s1 = inlined_call_operand.vmem [shape: f32[8,4], index: 1, kind: input, shape index: {}]   ;;  %s492_s2 = inlined_call_operand.vmem [shape: f32[8,1], index: 2, kind: input, shape index: {}]   ;;  %s493_s3 = inlined_call_operand.vmem [shape: f32[2,8,128], index: 3, kind: output, shape index: {}]  }
   0x1   :  { %s455_s14 = smov 0  }
   0x2 LB: > { %s25_s15 = sadd.s32 1, %s422_s13  ;;  %p362_p0 = scmp.ge.s32.totalorder %s426_s14, 1  ;;  %s426_s14 = sphi %s455_s14, %s13_s14   ;;  %s422_s13 = sphi %s453_s13, %s495_s13   ;;  %s418_s12 = sphi %s451_s12, %s494_s12  }
   0x3   : > { %p27_p1 = scmp.ge.s32.totalorder %s25_s15, 2  ;;  %p155_p2 = scmp.lt.s32.totalorder %s426_s14, 3 }
   0x5   : > { %s497_s15 = smov (%p27_p1, %s25_s15), 0  ;;  %p156_p3 = pnand %p362_p0, %p155_p2 }
   0x6   : > { %p183_p4 = scmp.lt.s32.totalorder (!%p156_p3), %s418_s12, 1  ;;  %v428_v0 = vmov (!%p156_p3), 0.0   ;;  %vm429_vm0 = vmmov (!%p156_p3), 0   ;;  %v199_v1 = vld [vmem:[%s492_s2] sm:$0xff] (!%p156_p3)  ;;  %v430_v2 = vmov (!%p156_p3), 0   ;;  %vm209_vm1 = vcmask (!%p156_p3), 1043456  }
   0x7   : > { %159 = sbr.rel (%p156_p3) target bundleno = 234 (0xea), region = 32  ;;  %371 = vmatprep.subr.mxu0 (!%p156_p3), %v428_v0  ;;  %373 = vmatprep.mubr.msk.f32.mxu0 (!%p156_p3), %vm429_vm0, %v428_v0  ;;  %v197_v3 = vld [vmem:[%s491_s1] sm:$0xff] (!%p156_p3)  ;;  %vm205_vm2 = vcmask (!%p156_p3), 31744  }
   0x8   : > { %403 = vset.pattern.permute.xlu0 (!%p156_p3), %v430_v2 }
   0x9   : > { %202 = vperm.xlu0 (!%p156_p3), %403, %v199_v1  }
   0xe   : > { %s499_s12 = smov (!%p183_p4, %s418_s12), 1 }
   0xf   : > { %s363_s18 = sshll.u32 %s499_s12, 2  ;;  %s364_s24 = sshll.u32 %s499_s12, 3 }
  0x10   : > { %s189_s21 = scalar_lea.vmem %s490_s0, %s363_s18  ;;  %s196_s27 = scalar_lea.vmem %s493_s3, %s364_s24 }
  0x11   : > { %v198_v4 = vld [vmem:[%s189_s21] sm:$0xf] }
  0x12   : > { %372 = vmatpush3.msk.msra.mxu0 %vm209_vm1, %v198_v4 }
  0x13   : > { %374 = vmatmul.mubr.msk.f32.vlgmr.msra.gmra.mrb[0].mxu0 %vm205_vm2, %v197_v3 }
  0x88   : > { %v203_v5 = vpop.permute.xlu0 %202 }
  0xe6   : > { %v279_v6 = vpop.f32.mrb[0].mxu0 }
  0xe7   : > { %v280_v7 = vadd.f32 %v279_v6, %v203_v5  ;;  %v375_v8 = vpop.f32.mrb[1].mxu0 }
  0xe9   : > { %283 = vst [vmem:[%s196_s27] sm:$0xff] %v280_v7 }
  0xea PF: > { %s13_s14 = sadd.s32 1, %s426_s14   ;;  %s494_s12 = smov %s422_s13 }
  0xeb   : > { %p10_p5 = scmp.ge.s32.totalorder %s13_s14, 4   ;;  %s495_s13 = smov %s497_s15 }
  0xed   :  { %12 = sbr.rel (!%p10_p5) target bundleno = 2 (0x2), region = 62 }

</bundles_post_ra>
